<compile_context>
chip_gen: v7x
topology: tpu7x:2x2x1
jax: 0.10.0
libtpu: 0.0.40
codegen_flags: <defaults>
</compile_context>

<pallas_src>
import functools

import jax
import jax.numpy as jnp
from jax import lax
from jax.experimental import pallas as pl
from jax.experimental.pallas import tpu as pltpu


# ----------------------------------------------------------------------------
# Kernel 1a: Cn_hidden linear (dropouts are eval no-ops).
#   feat = x @ Wh^T + bh        (Wh pre-transposed at param prep, bf16 MXU)
# ----------------------------------------------------------------------------
def _hidden_kernel(x_ref, whT_ref, bh_ref, feat_ref):
    feat_ref[...] = (
        jnp.dot(x_ref[...], whT_ref[...], preferred_element_type=jnp.float32)
        + bh_ref[...])


def hidden_feat(x, hidden_wT_bf16, hidden_b):
    # x: (B, 2H) f32 -> bf16; hidden_wT: (2H, H) bf16; hidden_b: (H,) f32
    B, Din = x.shape
    H = hidden_wT_bf16.shape[1]
    return pl.pallas_call(
        _hidden_kernel,
        grid=(1,),
        in_specs=[
            pl.BlockSpec((B, Din), lambda i: (0, 0)),
            pl.BlockSpec((Din, H), lambda i: (0, 0)),
            pl.BlockSpec((1, H), lambda i: (0, 0)),
        ],
        out_specs=pl.BlockSpec((B, H), lambda i: (0, 0)),
        out_shape=jax.ShapeDtypeStruct((B, H), jnp.float32),
        compiler_params=pltpu.CompilerParams(
            dimension_semantics=("arbitrary",),
            vmem_limit_bytes=32 * 1024 * 1024),
    )(x.astype(jnp.bfloat16), hidden_wT_bf16, hidden_b.reshape(1, H))


# ----------------------------------------------------------------------------
# Kernel 1b: tiled dense level-0 scoring.
#   logits[:, tile] = feat @ E0_T[:, tile] + b0[tile];  probs = sigmoid(logits)
# Table is pre-transposed to (H, C0) so the C0 output axis is lane-dense and
# no per-tile transpose (vxpose) is needed.  Grid tiles C0; feat block index
# is constant so it stays resident across tiles (auto-pipelined table stream).
# ----------------------------------------------------------------------------
def _level0_score_kernel(feat_ref, e0T_ref, b0_ref, probs_ref):
    logits = jnp.dot(feat_ref[...].astype(e0T_ref.dtype), e0T_ref[...],
                     preferred_element_type=jnp.float32) + b0_ref[...]
    probs_ref[...] = jax.nn.sigmoid(logits)


def level0_scores(feat, embed0_T, bias0, *, tn=None):
    # feat: (B, H) f32; embed0_T: (H, C0) bf16; bias0: (C0,) f32
    B, H = feat.shape
    C0 = embed0_T.shape[1]
    if tn is None:
        tn = C0 if C0 <= 512 else 512
    assert C0 % tn == 0
    assert tn == C0 or tn % 128 == 0          # lane-dense output tiles
    return pl.pallas_call(
        _level0_score_kernel,
        grid=(C0 // tn,),
        in_specs=[
            pl.BlockSpec((B, H), lambda j: (0, 0)),
            pl.BlockSpec((H, tn), lambda j: (0, j)),
            pl.BlockSpec((1, tn), lambda j: (0, j)),
        ],
        out_specs=pl.BlockSpec((B, tn), lambda j: (0, j)),
        out_shape=jax.ShapeDtypeStruct((B, C0), jnp.float32),
        compiler_params=pltpu.CompilerParams(
            dimension_semantics=("parallel",),
            vmem_limit_bytes=32 * 1024 * 1024),
    )(feat, embed0_T, bias0.reshape(1, C0).astype(jnp.float32))


# ----------------------------------------------------------------------------
# Kernel 2: per-level candidate scoring (levels >= 1) with the embedding
# gather fused into the kernel.
#   logits[b, c] = <E[cand[b, c]], feat[b]> + bias[b, c]
#   probs        = sigmoid(logits)          (last level: logits==0 -> -inf)
#   weighted     = probs * group_scores
# Grid = (batch, candidate-tiles).  Scalar prefetch: (B, k) selected cluster
# ids + (n_clusters,) cluster row-starts.  The embedding table stays in HBM
# (pl.ANY); each tile issues ONE (csize, H) DMA per cluster, double-buffered
# across the candidate-tile axis.
# ----------------------------------------------------------------------------
def _score_gather_kernel(is_last, gt, csize, nct,
                         sel_ref, starts_ref,                       # SMEM
                         feat_ref, bias_ref, gsc_ref, table_ref,    # inputs
                         probs_ref, wtd_ref,                        # outputs
                         rows_vmem, sem):                           # scratch
    b = pl.program_id(0)
    ct = pl.program_id(1)
    slot = ct & 1

    def issue(tile_idx, to_slot):
        # One (csize, H) DMA per cluster: gt descriptors per tile instead of
        # tc per-row copies.  Scalar (SMEM) reads happen before any .wait().
        for g in range(gt):
            cid = sel_ref[b, tile_idx * gt + g]
            row0 = starts_ref[cid]
            pltpu.make_async_copy(
                table_ref.at[pl.ds(row0, csize)],
                rows_vmem.at[to_slot, pl.ds(g * csize, csize)],
                sem.at[to_slot]).start()

    # Prime the double buffer at the first candidate tile of this batch row.
    @pl.when(ct == 0)
    def _():
        issue(ct, slot)

    # Prefetch the NEXT candidate tile into the other slot (other semaphore)
    # before waiting, so the gather overlaps this tile's wait + compute.
    @pl.when(ct + 1 < nct)
    def _():
        issue(ct + 1, 1 - slot)

    # Wait for this tile's gt cluster copies (identical shapes -> exact).
    for _g in range(gt):
        pltpu.make_async_copy(
            table_ref.at[pl.ds(0, csize)],
            rows_vmem.at[slot, pl.ds(0, csize)],
            sem.at[slot]).wait()

    f = feat_ref[0]                                  # (1, H) f32
    rows = rows_vmem[slot]                           # (tc, H) bf16
    logits = lax.dot_general(
        f.astype(rows.dtype), rows, (((1,), (1,)), ((), ())),
        preferred_element_type=jnp.float32)          # (1, tc) f32
    logits = logits + bias_ref[0]
    if is_last:
        # reference: torch.where(logits == 0.0, -inf, logits).sigmoid()
        logits = jnp.where(logits == 0.0, -jnp.inf, logits)
    probs = jax.nn.sigmoid(logits)                   # f32 epilogue
    probs_ref[0] = probs
    wtd_ref[0] = probs * gsc_ref[0]


def _pick_candidate_tile(C, csize, cap=1024):
    # Largest whole-cluster tile <= cap that divides C and is lane-dense.
    if C <= cap:
        return C
    best = None
    for t in range(csize, min(C, cap) + 1, csize):
        if C % t == 0 and t % 128 == 0:
            best = t
    return best if best is not None else C


def score_level(table, feat, bias_rows, group_scores, sel, cluster_starts,
                csize, is_last, *, tc=None):
    # table: (R, H) bf16 (stays in HBM); sel: (B, k) int32 selected cluster ids
    # feat: (B, H) f32; bias_rows / group_scores: (B, C) with C = k * csize
    B, k = sel.shape
    C = k * csize
    H = table.shape[1]
    if tc is None:
        tc = _pick_candidate_tile(C, csize)
    assert C % tc == 0 and tc % csize == 0
    assert tc == C or tc % 128 == 0              # lane-dense output tiles
    gt = tc // csize                             # clusters per tile
    nct = C // tc                                # candidate tiles per row

    feat3 = feat.reshape(B, 1, H)
    bias3 = bias_rows.reshape(B, 1, C).astype(jnp.float32)
    gsc3 = group_scores.reshape(B, 1, C).astype(jnp.float32)

    kernel = functools.partial(_score_gather_kernel, is_last, gt, csize, nct)
    probs, wtd = pl.pallas_call(
        kernel,
        grid_spec=pltpu.PrefetchScalarGridSpec(
            num_scalar_prefetch=2,
            grid=(B, nct),
            in_specs=[
                pl.BlockSpec((1, 1, H), lambda b, ct, sel, st: (b, 0, 0)),
                pl.BlockSpec((1, 1, tc), lambda b, ct, sel, st: (b, 0, ct)),
                pl.BlockSpec((1, 1, tc), lambda b, ct, sel, st: (b, 0, ct)),
                pl.BlockSpec(memory_space=pl.ANY),     # embedding table (HBM)
            ],
            out_specs=[
                pl.BlockSpec((1, 1, tc), lambda b, ct, sel, st: (b, 0, ct)),
                pl.BlockSpec((1, 1, tc), lambda b, ct, sel, st: (b, 0, ct)),
            ],
            scratch_shapes=[
                pltpu.VMEM((2, tc, H), table.dtype),   # double-buffered gather
                pltpu.SemaphoreType.DMA((2,)),
            ],
        ),
        out_shape=[
            jax.ShapeDtypeStruct((B, 1, C), jnp.float32),
            jax.ShapeDtypeStruct((B, 1, C), jnp.float32),
        ],
        compiler_params=pltpu.CompilerParams(
            # batch axis parallel (megacore); candidate-tile axis must be
            # sequential for the manual double buffer.
            dimension_semantics=("parallel", "arbitrary"),
            vmem_limit_bytes=16 * 1024 * 1024,
        ),
    )(sel.astype(jnp.int32), cluster_starts.astype(jnp.int32),
      feat3, bias3, gsc3, table)
    return probs.reshape(B, C), wtd.reshape(B, C)


# ----------------------------------------------------------------------------
# CascadeXML forward (inference path, is_training=False)
# ----------------------------------------------------------------------------
def feat_maker(recipe, bert_outs):
    feats = []
    for idx in recipe:
        if isinstance(idx, tuple):
            feats.append(jnp.concatenate([bert_outs[i][:, 0] for i in idx], axis=1))
        else:
            feats.append(bert_outs[idx][:, 0])
    return feats


def cascadexml_forward(p, bert_outs):
    outs = feat_maker(p["layers"], bert_outs)
    B = outs[0].shape[0]
    num_levels = len(p["num_ele"])

    all_probs, all_cands, all_weighted = [], [], []
    prev_probs, prev_cands = None, None

    for i in range(num_levels):
        is_last = i == num_levels - 1
        if i == 0:
            # Dense level 0: every row scores every meta label -> tiled matmul.
            C0 = p["num_ele"][0]
            candidates = jnp.broadcast_to(
                jnp.arange(C0, dtype=jnp.int32)[None], (B, C0))
            feat0 = hidden_feat(outs[0], p["hidden_wT"], p["hidden_b"])
            probs = level0_scores(feat0, p["Cn0_T"], p["Cn0_bias"])
            weighted = probs      # reference: weighted_scores = probs at i==0
        else:
            # get_candidates(): top-k shortlist + cluster expansion (JAX glue)
            k = p["topk"][i - 1]
            scores, idx = lax.top_k(prev_probs, k)                 # (B, k)
            sel = jnp.take_along_axis(prev_cands, idx, axis=1).astype(jnp.int32)
            cl = p["clusters"][i - 1][sel]                         # (B, k, csize)
            candidates = cl.reshape(B, -1).astype(jnp.int32)       # (B, C)
            group_scores = jnp.broadcast_to(
                scores[..., None], cl.shape).reshape(B, -1).astype(jnp.float32)

            # TODO(synk): the reference's last-level ragged filtering of padding
            # candidates (pad_sequence after dropping id == num_labels) is
            # skipped; here clusters are full, and the pad embedding / bias rows
            # are exactly zero (also exact in bf16), so the logits==0 -> -inf
            # mask forces their probability to 0 — same scores.
            bias_rows = p["Cn_bias"][i - 1][candidates, 0]         # (B, C) tiny
            probs, weighted = score_level(
                p["Cn"][i - 1], outs[i], bias_rows, group_scores,
                sel, p["cluster_starts"][i - 1], p["cluster_sizes"][i - 1],
                is_last)

        all_probs.append(probs)
        all_cands.append(candidates)
        all_weighted.append(weighted)
        prev_probs, prev_cands = probs, candidates

    return all_probs, all_cands, all_weighted


# ----------------------------------------------------------------------------
# Deterministic synthetic setup
# ----------------------------------------------------------------------------
def xavier_uniform(key, shape):
    fan_out, fan_in = shape
    bound = (6.0 / (fan_in + fan_out)) ** 0.5
    return jax.random.uniform(key, shape, jnp.float32, -bound, bound)


if __name__ == "__main__":
    B, L, H = 2, 8, 32                 # batch, seq, hidden
    num_labels = 4096
    num_ele = [8, 16, num_labels]      # 3 cascade levels -> layers [(7,8),10,12]
    layers = [(7, 8), 10, 12]
    topk = [4, 8]

    key = jax.random.PRNGKey(0)
    keys = jax.random.split(key, 32)

    # TODO(synk): BERT backbone is not reimplemented; replace its 13 hidden
    # states with deterministic synthetic features of the right shape.
    bert_outs = [
        jax.random.normal(keys[i], (B, L, H), jnp.float32) * 0.5
        for i in range(13)
    ]

    # Label tree (exact partition into contiguous, equal-size clusters).
    clusters = [
        jnp.arange(num_ele[1], dtype=jnp.int32).reshape(num_ele[0], -1),   # 8 -> 16 meta
        jnp.arange(num_labels, dtype=jnp.int32).reshape(num_ele[1], -1),   # 16 -> 4096 labels
    ]
    cluster_sizes = [int(c.shape[1]) for c in clusters]
    cluster_starts = [c[:, 0].astype(jnp.int32) for c in clusters]
    # Per-cluster batched DMAs rely on contiguous cluster label ranges.
    for c in clusters:
        exp = c[:, :1] + jnp.arange(c.shape[1], dtype=jnp.int32)[None]
        assert bool(jnp.all(c == exp)), "clusters must be contiguous ranges"

    # Classifier parameters (deterministic init, mirroring __init__ shapes).
    hidden_w = xavier_uniform(keys[20], (H, 2 * H))                  # Cn_hidden Linear
    hidden_b = jax.random.uniform(keys[21], (H,), jnp.float32, -0.05, 0.05)
    hidden_wT = hidden_w.T.astype(jnp.bfloat16)      # static pre-transpose, bf16

    # Embedding tables in bf16 (halves HBM traffic of the dominant tensors);
    # dots accumulate in f32.  Level-0 table pre-transposed to (H, C0).
    # The padding row of the last table is zeroed BEFORE the cast so it stays
    # exactly zero in bf16.
    Cn0_T = xavier_uniform(keys[22], (num_ele[0], H)).T.astype(jnp.bfloat16)
    Cn1 = xavier_uniform(keys[23], (num_ele[1], H)).astype(jnp.bfloat16)
    Cn2 = (xavier_uniform(keys[24], (num_labels + 1, H))
           .at[-1].set(0.0).astype(jnp.bfloat16))

    Cn0_bias = jnp.zeros((num_ele[0],), jnp.float32)
    Cn1_bias = jnp.zeros((num_ele[1], 1), jnp.float32)
    Cn2_bias = jnp.zeros((num_labels + 1, 1), jnp.float32)

    # Correctness guards for the last-level logits==0 sentinel masking.
    assert bool(jnp.all(Cn2[-1] == 0)), "pad embedding row must be exactly 0"
    assert bool(jnp.all(Cn2_bias[-1] == 0)), "pad bias row must be exactly 0"

    params = {
        "layers": layers,
        "num_ele": num_ele,
        "topk": topk,
        "clusters": clusters,
        "cluster_sizes": cluster_sizes,
        "cluster_starts": cluster_starts,
        "hidden_wT": hidden_wT,
        "hidden_b": hidden_b,
        "Cn0_T": Cn0_T,
        "Cn0_bias": Cn0_bias,
        "Cn": [Cn1, Cn2],
        "Cn_bias": [Cn1_bias, Cn2_bias],
    }

    all_probs, all_cands, all_weighted = cascadexml_forward(params, bert_outs)
    jax.block_until_ready((all_probs, all_cands, all_weighted))

    # sanity: shapes of cascade outputs
    expected = [(B, num_ele[0]),
                (B, topk[0] * cluster_sizes[0]),
                (B, topk[1] * cluster_sizes[1])]
    assert [tuple(x.shape) for x in all_probs] == expected
    assert [tuple(x.shape) for x in all_cands] == expected
    assert all(w.shape == p_.shape for w, p_ in zip(all_weighted, all_probs))
    assert all(bool(jnp.all(jnp.isfinite(p_))) for p_ in all_probs)

    print("KERNEL_OK")
</pallas_src>

<mosaic_0001>
module attributes {stable_mosaic.version = 11 : i64} {
  func.func @_hidden_kernel(%arg0: i32, %arg1: memref<2x64xbf16, #tpu.memory_space<vmem>>, %arg2: memref<64x32xbf16, #tpu.memory_space<vmem>>, %arg3: memref<1x32xf32, #tpu.memory_space<vmem>>, %arg4: memref<2x32xf32, #tpu.memory_space<vmem>>) attributes {dimension_semantics = [#tpu.dimension_semantics<arbitrary>], iteration_bounds = array<i64: 1>, scalar_prefetch = 0 : i64, scratch_operands = 0 : i64, tpu.core_type = #tpu.core_type<tc>, window_params = [{pipeline_mode = #tpu.pipeline_mode<synchronous>, transform_indices = @transform_0, window_bounds = array<i64: 2, 64>}, {pipeline_mode = #tpu.pipeline_mode<synchronous>, transform_indices = @transform_1, window_bounds = array<i64: 64, 32>}, {pipeline_mode = #tpu.pipeline_mode<synchronous>, transform_indices = @transform_2, window_bounds = array<i64: 1, 32>}, {pipeline_mode = #tpu.pipeline_mode<synchronous>, transform_indices = @transform_3, window_bounds = array<i64: 2, 32>}]} {
    %c0 = arith.constant 0 : index
    %c0_0 = arith.constant 0 : index
    %0 = vector.load %arg1[%c0, %c0_0] : memref<2x64xbf16, #tpu.memory_space<vmem>>, vector<2x64xbf16>
    %c0_1 = arith.constant 0 : index
    %c0_2 = arith.constant 0 : index
    %1 = vector.load %arg2[%c0_1, %c0_2] : memref<64x32xbf16, #tpu.memory_space<vmem>>, vector<64x32xbf16>
    %cst = arith.constant dense<0.000000e+00> : vector<2x32xf32>
    %2 = tpu.matmul %0, %1, %cst {dimension_numbers = #tpu.dot_dimension_numbers<[1], [0], [0], [1], [0, 0, 1, 1], [], []>} : vector<2x64xbf16>, vector<64x32xbf16>, vector<2x32xf32> -> vector<2x32xf32>
    %c0_3 = arith.constant 0 : index
    %c0_4 = arith.constant 0 : index
    %3 = vector.load %arg3[%c0_3, %c0_4] : memref<1x32xf32, #tpu.memory_space<vmem>>, vector<1x32xf32>
    %4 = vector.broadcast %3 : vector<1x32xf32> to vector<2x32xf32>
    %5 = arith.addf %2, %4 : vector<2x32xf32>
    %c0_5 = arith.constant 0 : index
    %c0_6 = arith.constant 0 : index
    %6 = vector.load %arg4[%c0_5, %c0_6] : memref<2x32xf32, #tpu.memory_space<vmem>>, vector<2x32xf32>
    tpu.vector_store %arg4[%c0_5, %c0_6], %5 {strides = array<i32>} : memref<2x32xf32, #tpu.memory_space<vmem>>, vector<2x32xf32>,
    return
  }
  func.func @transform_0(%arg0: i32) -> (i32, i32) {
    %c0_i32 = arith.constant 0 : i32
    %c0_i32_0 = arith.constant 0 : i32
    %c0_i32_1 = arith.constant 0 : i32
    return %c0_i32, %c0_i32_0 : i32, i32
  }
  func.func @transform_1(%arg0: i32) -> (i32, i32) {
    %c0_i32 = arith.constant 0 : i32
    %c0_i32_0 = arith.constant 0 : i32
    %c0_i32_1 = arith.constant 0 : i32
    return %c0_i32, %c0_i32_0 : i32, i32
  }
  func.func @transform_2(%arg0: i32) -> (i32, i32) {
    %c0_i32 = arith.constant 0 : i32
    %c0_i32_0 = arith.constant 0 : i32
    %c0_i32_1 = arith.constant 0 : i32
    return %c0_i32, %c0_i32_0 : i32, i32
  }
  func.func @transform_3(%arg0: i32) -> (i32, i32) {
    %c0_i32 = arith.constant 0 : i32
    %c0_i32_0 = arith.constant 0 : i32
    %c0_i32_1 = arith.constant 0 : i32
    return %c0_i32, %c0_i32_0 : i32, i32
  }
}

</mosaic_0001>

<bundles_post_ra>
// kernel: tpu_custom_call.1
= control target key start
LH: loop header
LB: loop body
LE: loop exit
PB: predicated region body
PF: predicated region fallthrough
CT: control target
= control target key end

     0   :  { %v170_v1 = vmov 0.0   ;;  %vm171_vm0 = vmmov 0   ;;  %s223_s0 = inlined_call_operand.vmem [shape: bf16[2,64], index: 0, kind: input, shape index: {}]   ;;  %s224_s1 = inlined_call_operand.vmem [shape: bf16[64,32], index: 1, kind: input, shape index: {}]   ;;  %s225_s2 = inlined_call_operand.vmem [shape: f32[1,32], index: 2, kind: input, shape index: {}]   ;;  %s226_s3 = inlined_call_operand.hbm [shape: f32[2,32], index: 3, kind: output, shape index: {}]  }
   0x1   :  { %v142_v0 = vld [vmem:[%s224_s1] sm:$0xff]   ;;  %127 = vmatprep.subr.bf16.mxu0 %v170_v1  ;;  %v143_v2 = vld [vmem:[%s224_s1 + $0x8] sm:$0xff]   ;;  %135 = vmatprep.mubr.msk.bf16.mxu0 %vm171_vm0, %v170_v1 }
   0x2   :  { %128 = vmatpush3.bf16.msra.mxu0 %v142_v0 }
   0x3   :  { %129 = vmatprep.subr.bf16.mxu0 %v170_v1 }
   0x4   :  { %8 = vsyncpa [#allocation3], 0  ;;  %v144_v3 = vld [vmem:[%s224_s1 + $0x10] sm:$0xff]   ;;  %v145_v4 = vld [vmem:[%s224_s1 + $0x18] sm:$0xff]   ;;  %vm56_vm1 = vcmask 523264   ;;  %s172_s24 = smov [#allocation2]  }
   0x5   :  { %v16_v5 = vld [vmem:[%s223_s0] sm:$0x1]  ;;  %s108_s25 = sshll.u32 %s172_s24, 4  ;;  %vm100_vm2 = vcmask 254976   ;;  %s109_s25 = int_to_ptr.vmem [resolvable:$true] %s108_s25 }
   0x6   :  { %130 = vmatpush3.bf16.msra.mxu0 %v143_v2  ;;  %v116_v6 = vld [vmem:[%s225_s2] ss:$0 sm:$0xff]  ;;  %s146_s1 = scalar_lea.vmem %s109_s25, 32  ;;  %p151_p1 = scmp.lt.s32.totalorder %s109_s25, %s109_s25 }
   0x7   :  { %131 = vmatprep.subr.bf16.mxu0 %v170_v1  ;;  %p147_p0 = scmp.ne.s32.totalorder %s109_s25, %s146_s1  ;;  %p152_p2 = scmp.lt.s32.totalorder %s146_s1, %s146_s1 }
   0x9   :  { %p153_p3 = por %p152_p2, %p151_p1 }
   0xa   :  { %132 = vmatpush3.bf16.msra.mxu0 %v144_v3 }
   0xb   :  { %133 = vmatprep.subr.bf16.mxu0 %v170_v1  ;;  %p154_p4 = pnand %p153_p3, %p147_p0 }
   0xe   :  { %134 = vmatpush3.bf16.msra.mxu0 %v145_v4 }
  0x11   :  { %136 = vmatmul.mubr.msk.bf16.vlgmr.msra.gmra.mrb[0].mxu0 %vm56_vm1, %v16_v5 }
  0xe4   :  { %v94_v7 = vpop.f32.mrb[0].mxu0 }
  0xe5   :  { %v95_v8 = vadd.f32 %v116_v6, %v94_v7  ;;  %v137_v9 = vpop.f32.mrb[1].mxu0 }
  0xe6   :  { %v97_v10 = vpop.f32.mrb[2].mxu0 }
  0xe7   :  { %v138_v11 = vpop.f32.mrb[3].mxu0  ;;  %101 = vst.msk [vmem:[#allocation2] sm:$0x3] %vm100_vm2, %v95_v8 }
  0xe8   :  { %157 = shalt.err (!%p154_p4)
}
  0xe9   :  { %s158_s2 = scalar_lea.hbm %s226_s3, 32 }
  0xea   :  { %p159_p5 = scmp.ne.s32.totalorder %s226_s3, %s158_s2  ;;  %p162_p6 = scmp.lt.u32.totalorder %s158_s2, %s226_s3 }
  0xec   :  { %p164_p7 = pnand %p162_p6, %p159_p5 }
  0xee   :  { %167 = shalt.err (!%p164_p7)
}
  0xef   :  { %111 = dma.vmem_to_hbm [thread:$0]  %s109_s25, 32, %s226_s3, [#allocation3]  }
  0xf0   :  { %168 = dma.done.wait [#allocation3], 32  }
  0xf1   :  { %169 = vsyncadd [#allocation3], 4294967264 }
  0xf2   :  { %115 = vsyncpa [#allocation3], 1 }

</bundles_post_ra>
